<compile_context>
chip_gen: v7x
topology: tpu7x:2x2x1
jax: 0.10.0
libtpu: 0.0.40
codegen_flags: <defaults>
</compile_context>

<pallas_src>
import jax
import jax.numpy as jnp
from jax.experimental import pallas as pl
from jax.experimental.pallas import tpu as pltpu


def _label_prior_kernel(x_ref, w0_ref, b0_ref, w1_ref, b1_ref, w2_ref, b2_ref,
                        out_ref):
    """Fused 2-hidden-layer tanh MLP with the batch on the lane axis.

    x_ref   : (u_dim, TB)    one batch tile of u, transposed
    w*_ref  : (out, in)      PyTorch nn.Linear weight layout
    b*_ref  : (out, 1)
    out_ref : (2*z_dim, TB)  fused [mean; log_var] tile (lane-dense store)
    """
    x = x_ref[...]
    h = jnp.tanh(
        jnp.dot(w0_ref[...], x, preferred_element_type=jnp.float32) + b0_ref[...])
    h = jnp.tanh(
        jnp.dot(w1_ref[...], h, preferred_element_type=jnp.float32) + b1_ref[...])
    out = jnp.dot(w2_ref[...], h, preferred_element_type=jnp.float32) + b2_ref[...]
    out_ref[...] = out.astype(out_ref.dtype)


def _round_up(x: int, m: int) -> int:
    return ((x + m - 1) // m) * m


# ~ (u_dim + 2*z_dim)*4 B/col double-buffered + ~2*H*4 B/col intermediates
# => ~6 MiB at 16384 columns: safely under every generation's scoped VMEM.
_MAX_TILE_COLS = 16384


def _default_batch_tile(batch: int) -> int:
    if batch < 256:
        # Can't form two >=128-lane tiles; single tile / grid of 1.  On
        # 1-TensorCore chips (v5e/v6e) extra grid steps are pure overhead.
        return batch
    # Two lane-aligned tiles -> one per v7x TensorCore via "parallel" axis.
    half = -(-batch // 2)
    return min(_round_up(half, 128), _MAX_TILE_COLS)


def label_prior_continuous(u, params, *, z_dim: int, batch_tile: int | None = None):
    """Pallas forward: returns (mean, log_var), each (batch, z_dim)."""
    w0, b0, w1, b1, w2, b2 = params          # PyTorch layout: W (out,in), b (out,)
    B, u_dim = u.shape
    hidden = w0.shape[0]
    out_dim = w2.shape[0]                    # == 2 * z_dim
    assert out_dim == 2 * z_dim

    if batch_tile is None:
        batch_tile = _default_batch_tile(B)
    if batch_tile >= B:
        batch_tile = B                       # full-array block: any size is legal
    else:
        batch_tile = _round_up(batch_tile, 128)   # lane-aligned partial tiles
    num_tiles = pl.cdiv(B, batch_tile)       # ragged tail handled by Pallas masking

    # Wrapper-side layout plumbing: batch goes on lanes inside the kernel.
    x = u.T                                  # (u_dim, B)
    b0c = b0.reshape(hidden, 1)
    b1c = b1.reshape(hidden, 1)
    b2c = b2.reshape(out_dim, 1)

    resident = lambda shape: pl.BlockSpec(shape, lambda i: (0, 0))

    itemsize = jnp.dtype(u.dtype).itemsize
    param_bytes = sum(int(p.size) for p in (w0, b0, w1, b1, w2, b2)) * itemsize
    cost = pl.CostEstimate(
        flops=2 * B * (u_dim * hidden + hidden * hidden + hidden * out_dim),
        transcendentals=2 * B * hidden,
        bytes_accessed=B * (u_dim + out_dim) * itemsize + param_bytes,
    )

    out_t = pl.pallas_call(
        _label_prior_kernel,
        out_shape=jax.ShapeDtypeStruct((out_dim, B), u.dtype),
        grid_spec=pltpu.PrefetchScalarGridSpec(
            num_scalar_prefetch=0,
            grid=(num_tiles,),
            in_specs=[
                pl.BlockSpec((u_dim, batch_tile), lambda i: (0, i)),   # u tile
                resident(w0.shape), resident((hidden, 1)),
                resident(w1.shape), resident((hidden, 1)),
                resident(w2.shape), resident((out_dim, 1)),
            ],
            out_specs=pl.BlockSpec((out_dim, batch_tile), lambda i: (0, i)),
        ),
        compiler_params=pltpu.CompilerParams(
            dimension_semantics=("parallel",),
            vmem_limit_bytes=32 * 1024 * 1024),
        cost_estimate=cost,
    )(x, w0, b0c, w1, b1c, w2, b2c)

    # torch.chunk(z_prior, 2, dim=-1) + un-transpose: tiny wrapper-side ops.
    return out_t[:z_dim].T, out_t[z_dim:].T


def init_params(key, u_dim, z_dim, hidden_dim):
    """PyTorch nn.Linear layout/init: W (out,in), b (out,), U(+-1/sqrt(fan_in))."""
    def linear(k, fan_in, fan_out):
        kw, kb = jax.random.split(k)
        bound = 1.0 / jnp.sqrt(fan_in)
        w = jax.random.uniform(kw, (fan_out, fan_in), jnp.float32, -bound, bound)
        b = jax.random.uniform(kb, (fan_out,), jnp.float32, -bound, bound)
        return w, b

    k0, k1, k2 = jax.random.split(key, 3)
    w0, b0 = linear(k0, u_dim, hidden_dim)           # input layer
    w1, b1 = linear(k1, hidden_dim, hidden_dim)      # 2nd hidden layer
    w2, b2 = linear(k2, hidden_dim, 2 * z_dim)       # output layer (z_dim * 2)
    return (w0, b0, w1, b1, w2, b2)


def reference_forward(u, params, z_dim):
    w0, b0, w1, b1, w2, b2 = params
    h = jnp.tanh(u @ w0.T + b0)
    h = jnp.tanh(h @ w1.T + b1)
    out = h @ w2.T + b2
    return out[:, :z_dim], out[:, z_dim:]


if __name__ == "__main__":
    # Shapes consistent with the module defaults: u_dim=4, z_dim=4, hidden=32.
    U_DIM, Z_DIM, HIDDEN = 4, 4, 32

    key = jax.random.PRNGKey(0)
    k_p, k1, k2, k3 = jax.random.split(key, 4)
    params = init_params(k_p, U_DIM, Z_DIM, HIDDEN)

    def check(u):
        mean, log_var = label_prior_continuous(u, params, z_dim=Z_DIM)
        jax.block_until_ready((mean, log_var))
        ref_m, ref_v = reference_forward(u, params, Z_DIM)
        assert mean.shape == (u.shape[0], Z_DIM)
        assert log_var.shape == (u.shape[0], Z_DIM)
        assert jnp.allclose(mean, ref_m, atol=1e-5, rtol=1e-5)
        assert jnp.allclose(log_var, ref_v, atol=1e-5, rtol=1e-5)

    # Case 1: tiny batch -> single full-batch tile, grid of 1.
    check(jax.random.normal(k1, (8, U_DIM), jnp.float32))

    # Case 2: small ragged batch -> still a single full-batch tile.
    check(jax.random.normal(k2, (20, U_DIM), jnp.float32))

    # Case 3: batch split into two 128-aligned tiles with a masked ragged tail
    # (exercises the parallel 2-step grid and partial-final-block path).
    check(jax.random.normal(k3, (300, U_DIM), jnp.float32))

    print("KERNEL_OK")
</pallas_src>

<mosaic_0001>
module attributes {stable_mosaic.version = 11 : i64} {
  func.func @_label_prior_kernel(%arg0: i32, %arg1: memref<4x8xf32, #tpu.memory_space<vmem>>, %arg2: memref<32x4xf32, #tpu.memory_space<vmem>>, %arg3: memref<32x1xf32, #tpu.memory_space<vmem>>, %arg4: memref<32x32xf32, #tpu.memory_space<vmem>>, %arg5: memref<32x1xf32, #tpu.memory_space<vmem>>, %arg6: memref<8x32xf32, #tpu.memory_space<vmem>>, %arg7: memref<8x1xf32, #tpu.memory_space<vmem>>, %arg8: memref<8x8xf32, #tpu.memory_space<vmem>>) attributes {dimension_semantics = [#tpu.dimension_semantics<parallel>], iteration_bounds = array<i64: 1>, scalar_prefetch = 0 : i64, scratch_operands = 0 : i64, tpu.core_type = #tpu.core_type<tc>, window_params = [{transform_indices = @transform_0, window_bounds = array<i64: 4, 8>}, {pipeline_mode = #tpu.pipeline_mode<synchronous>, transform_indices = @transform_1, window_bounds = array<i64: 32, 4>}, {pipeline_mode = #tpu.pipeline_mode<synchronous>, transform_indices = @transform_2, window_bounds = array<i64: 32, 1>}, {pipeline_mode = #tpu.pipeline_mode<synchronous>, transform_indices = @transform_3, window_bounds = array<i64: 32, 32>}, {pipeline_mode = #tpu.pipeline_mode<synchronous>, transform_indices = @transform_4, window_bounds = array<i64: 32, 1>}, {pipeline_mode = #tpu.pipeline_mode<synchronous>, transform_indices = @transform_5, window_bounds = array<i64: 8, 32>}, {pipeline_mode = #tpu.pipeline_mode<synchronous>, transform_indices = @transform_6, window_bounds = array<i64: 8, 1>}, {transform_indices = @transform_7, window_bounds = array<i64: 8, 8>}]} {
    %c0 = arith.constant 0 : index
    %c0_0 = arith.constant 0 : index
    %0 = vector.load %arg1[%c0, %c0_0] : memref<4x8xf32, #tpu.memory_space<vmem>>, vector<4x8xf32>
    %c0_1 = arith.constant 0 : index
    %c0_2 = arith.constant 0 : index
    %1 = vector.load %arg2[%c0_1, %c0_2] : memref<32x4xf32, #tpu.memory_space<vmem>>, vector<32x4xf32>
    %cst = arith.constant dense<0.000000e+00> : vector<32x8xf32>
    %2 = tpu.matmul %1, %0, %cst {dimension_numbers = #tpu.dot_dimension_numbers<[1], [0], [0], [1], [0, 0, 1, 1], [], []>} : vector<32x4xf32>, vector<4x8xf32>, vector<32x8xf32> -> vector<32x8xf32>
    %c0_3 = arith.constant 0 : index
    %c0_4 = arith.constant 0 : index
    %3 = vector.load %arg3[%c0_3, %c0_4] : memref<32x1xf32, #tpu.memory_space<vmem>>, vector<32x1xf32>
    %4 = vector.broadcast %3 : vector<32x1xf32> to vector<32x8xf32>
    %5 = arith.addf %2, %4 : vector<32x8xf32>
    %6 = math.tanh %5 : vector<32x8xf32>
    %c0_5 = arith.constant 0 : index
    %c0_6 = arith.constant 0 : index
    %7 = vector.load %arg4[%c0_5, %c0_6] : memref<32x32xf32, #tpu.memory_space<vmem>>, vector<32x32xf32>
    %cst_7 = arith.constant dense<0.000000e+00> : vector<32x8xf32>
    %8 = tpu.matmul %7, %6, %cst_7 {dimension_numbers = #tpu.dot_dimension_numbers<[1], [0], [0], [1], [0, 0, 1, 1], [], []>} : vector<32x32xf32>, vector<32x8xf32>, vector<32x8xf32> -> vector<32x8xf32>
    %c0_8 = arith.constant 0 : index
    %c0_9 = arith.constant 0 : index
    %9 = vector.load %arg5[%c0_8, %c0_9] : memref<32x1xf32, #tpu.memory_space<vmem>>, vector<32x1xf32>
    %10 = vector.broadcast %9 : vector<32x1xf32> to vector<32x8xf32>
    %11 = arith.addf %8, %10 : vector<32x8xf32>
    %12 = math.tanh %11 : vector<32x8xf32>
    %c0_10 = arith.constant 0 : index
    %c0_11 = arith.constant 0 : index
    %13 = vector.load %arg6[%c0_10, %c0_11] : memref<8x32xf32, #tpu.memory_space<vmem>>, vector<8x32xf32>
    %cst_12 = arith.constant dense<0.000000e+00> : vector<8x8xf32>
    %14 = tpu.matmul %13, %12, %cst_12 {dimension_numbers = #tpu.dot_dimension_numbers<[1], [0], [0], [1], [0, 0, 1, 1], [], []>} : vector<8x32xf32>, vector<32x8xf32>, vector<8x8xf32> -> vector<8x8xf32>
    %c0_13 = arith.constant 0 : index
    %c0_14 = arith.constant 0 : index
    %15 = vector.load %arg7[%c0_13, %c0_14] : memref<8x1xf32, #tpu.memory_space<vmem>>, vector<8x1xf32>
    %16 = vector.broadcast %15 : vector<8x1xf32> to vector<8x8xf32>
    %17 = arith.addf %14, %16 : vector<8x8xf32>
    %c0_15 = arith.constant 0 : index
    %c0_16 = arith.constant 0 : index
    %18 = vector.load %arg8[%c0_15, %c0_16] : memref<8x8xf32, #tpu.memory_space<vmem>>, vector<8x8xf32>
    tpu.vector_store %arg8[%c0_15, %c0_16], %17 {strides = array<i32>} : memref<8x8xf32, #tpu.memory_space<vmem>>, vector<8x8xf32>,
    return
  }
  func.func @transform_0(%arg0: i32) -> (i32, i32) {
    %c0_i32 = arith.constant 0 : i32
    %c0_i32_0 = arith.constant 0 : i32
    return %c0_i32, %arg0 : i32, i32
  }
  func.func @transform_1(%arg0: i32) -> (i32, i32) {
    %c0_i32 = arith.constant 0 : i32
    %c0_i32_0 = arith.constant 0 : i32
    %c0_i32_1 = arith.constant 0 : i32
    return %c0_i32, %c0_i32_0 : i32, i32
  }
  func.func @transform_2(%arg0: i32) -> (i32, i32) {
    %c0_i32 = arith.constant 0 : i32
    %c0_i32_0 = arith.constant 0 : i32
    %c0_i32_1 = arith.constant 0 : i32
    return %c0_i32, %c0_i32_0 : i32, i32
  }
  func.func @transform_3(%arg0: i32) -> (i32, i32) {
    %c0_i32 = arith.constant 0 : i32
    %c0_i32_0 = arith.constant 0 : i32
    %c0_i32_1 = arith.constant 0 : i32
    return %c0_i32, %c0_i32_0 : i32, i32
  }
  func.func @transform_4(%arg0: i32) -> (i32, i32) {
    %c0_i32 = arith.constant 0 : i32
    %c0_i32_0 = arith.constant 0 : i32
    %c0_i32_1 = arith.constant 0 : i32
    return %c0_i32, %c0_i32_0 : i32, i32
  }
  func.func @transform_5(%arg0: i32) -> (i32, i32) {
    %c0_i32 = arith.constant 0 : i32
    %c0_i32_0 = arith.constant 0 : i32
    %c0_i32_1 = arith.constant 0 : i32
    return %c0_i32, %c0_i32_0 : i32, i32
  }
  func.func @transform_6(%arg0: i32) -> (i32, i32) {
    %c0_i32 = arith.constant 0 : i32
    %c0_i32_0 = arith.constant 0 : i32
    %c0_i32_1 = arith.constant 0 : i32
    return %c0_i32, %c0_i32_0 : i32, i32
  }
  func.func @transform_7(%arg0: i32) -> (i32, i32) {
    %c0_i32 = arith.constant 0 : i32
    %c0_i32_0 = arith.constant 0 : i32
    return %c0_i32, %arg0 : i32, i32
  }
}

</mosaic_0001>

<bundles_post_ra>
// kernel: tpu_custom_call.1
= control target key start
LH: loop header
LB: loop body
LE: loop exit
PB: predicated region body
PF: predicated region fallthrough
CT: control target
= control target key end

     0   :  { %vm69_vm0 = vcmask 1043456   ;;  %vm56_vm1 = vcmask 31744   ;;  %v510_v5 = vmov 0   ;;  %s633_s0 = inlined_call_operand.vmem [shape: f32[4,8], index: 0, kind: input, shape index: {}]   ;;  %s634_s1 = inlined_call_operand.vmem [shape: f32[32,4], index: 1, kind: input, shape index: {}]   ;;  %s635_s2 = inlined_call_operand.vmem [shape: f32[32,1], index: 2, kind: input, shape index: {}]   ;;  %s636_s3 = inlined_call_operand.vmem [shape: f32[32,32], index: 3, kind: input, shape index: {}]   ;;  %s637_s4 = inlined_call_operand.vmem [shape: f32[32,1], index: 4, kind: input, shape index: {}]   ;;  %s638_s5 = inlined_call_operand.vmem [shape: f32[8,32], index: 5, kind: input, shape index: {}]   ;;  %s639_s6 = inlined_call_operand.vmem [shape: f32[8,1], index: 6, kind: input, shape index: {}]   ;;  %s640_s7 = inlined_call_operand.hbm [shape: f32[8,8], index: 7, kind: output, shape index: {}]  }
   0x1   :  { %v27_v0 = vld [vmem:[%s633_s0] sm:$0xf]  ;;  %v29_v2 = vld [vmem:[%s634_s1 + $0x8] sm:$0xff]  ;;  %v30_v3 = vld [vmem:[%s634_s1 + $0x10] sm:$0xff]  ;;  %468 = vset.pattern.permute.xlu0 %v510_v5  ;;  %469 = vset.pattern.permute.xlu1 %v510_v5 }
   0x2   :  { %v28_v1 = vld [vmem:[%s634_s1] sm:$0xff]  ;;  %416 = vmatprep.subr.msk.mxu0 %vm69_vm0, %v27_v0  ;;  %v34_v6 = vld [vmem:[%s635_s2 + $0x10] sm:$0xff]  ;;  %v31_v7 = vld [vmem:[%s634_s1 + $0x18] sm:$0xff] }
   0x3   :  { %418 = vmatprep.mubr.msk.f32.mxu0 %vm56_vm1, %v28_v1  ;;  %v32_v4 = vld [vmem:[%s635_s2] sm:$0xff]  ;;  %417 = vmatpush3.msk.msra.mxu0 %vm69_vm0, %v27_v0  ;;  %v33_v8 = vld [vmem:[%s635_s2 + $0x8] sm:$0xff] }
   0x4   :  { %419 = vmatmul.mubr.msk.f32.vlgmr.msra.gmra.mrb[0].mxu0 %vm56_vm1, %v29_v2  ;;  %38 = vperm.xlu0 %468, %v32_v4  }
   0x5   :  { %421 = vmatprep.mubr.msk.f32.mxu0 %vm56_vm1, %v30_v3 }
   0x6   :  { %12 = vsyncpa [#allocation3], 0  ;;  %48 = vperm.xlu1 %469, %v34_v6   ;;  %v35_v9 = vld [vmem:[%s635_s2 + $0x18] sm:$0xff]  ;;  %v166_v10 = vld [vmem:[%s637_s4] sm:$0xff]  ;;  %vm190_vm2 = vcmask 261120   ;;  %v511_v37 = vmov 0.0|0.0  }
   0x7   :  { %v167_v11 = vld [vmem:[%s637_s4 + $0x8] sm:$0xff]  ;;  %v168_v12 = vld [vmem:[%s637_s4 + $0x10] sm:$0xff]  ;;  %v169_v13 = vld [vmem:[%s637_s4 + $0x18] sm:$0xff]  ;;  %457 = vmatprep.subr.bf16.mxu0 %v511_v37  ;;  %vm512_vm3 = vmmov 0   ;;  %v513_v38 = vmov 0.0   ;;  %s514_s10 = smov [#allocation2]  }
   0x8   :  { %422 = vmatmul.mubr.msk.f32.gmra.mrb[2].mxu0 %vm56_vm1, %v31_v7  ;;  %43 = vperm.xlu0 %468, %v33_v8   ;;  %v293_v14 = vld [vmem:[%s639_s6] sm:$0xff]  ;;  %v163_v34 = vld [vmem:[%s636_s3 + $0x8] sm:$0xff]  ;;  %v164_v35 = vld [vmem:[%s636_s3 + $0x10] sm:$0xff]  ;;  %s380_s0 = sshll.u32 %s514_s10, 4  ;;  %vm372_vm4 = vcmask 64512   ;;  %s381_s0 = int_to_ptr.vmem [resolvable:$true] %s380_s0 }
   0x9   :  { %v162_v15 = vld [vmem:[%s636_s3] sm:$0xff]  ;;  %v165_v36 = vld [vmem:[%s636_s3 + $0x18] sm:$0xff]  ;;  %446 = vmatprep.mubr.msk.f32.mxu0 %vm512_vm3, %v513_v38  ;;  %s486_s11 = scalar_lea.vmem %s381_s0, 128  ;;  %p491_p1 = scmp.lt.s32.totalorder %s381_s0, %s381_s0 }
   0xa   :  { %53 = vperm.xlu1 %469, %v35_v9   ;;  %432 = vmatprep.mubr.msk.f32.mxu1 %vm190_vm2, %v162_v15  ;;  %v292_v57 = vld [vmem:[%s638_s5] sm:$0xff]  ;;  %p487_p0 = scmp.ne.s32.totalorder %s381_s0, %s486_s11  ;;  %p492_p2 = scmp.lt.s32.totalorder %s486_s11, %s486_s11 }
   0xc   :  { %172 = vperm.xlu0 %468, %v166_v10   ;;  %p493_p3 = por %p492_p2, %p491_p1 }
   0xe   :  { %177 = vperm.xlu1 %469, %v167_v11   ;;  %p494_p4 = pnand %p493_p3, %p487_p0 }
  0x10   :  { %182 = vperm.xlu0 %468, %v168_v12  }
  0x12   :  { %187 = vperm.xlu1 %469, %v169_v13  }
  0x14   :  { %296 = vperm.xlu0 %468, %v293_v14  }
  0x83   :  { %v39_v16 = vpop.permute.xlu0 %38 }
  0x85   :  { %v49_v17 = vpop.permute.xlu1 %48 }
  0x87   :  { %v44_v18 = vpop.permute.xlu0 %43 }
  0x89   :  { %v54_v23 = vpop.permute.xlu1 %53 }
  0x8b   :  { %v173_v40 = vpop.permute.xlu0 %172 }
  0x8d   :  { %v178_v39 = vpop.permute.xlu1 %177 }
  0x8f   :  { %v183_v47 = vpop.permute.xlu0 %182 }
  0x91   :  { %v188_v45 = vpop.permute.xlu1 %187 }
  0x93   :  { %v297_v58 = vpop.permute.xlu0 %296 }
  0xd7   :  { %v420_v19 = vpop.f32.mrb[0].mxu0 }
  0xd8   :  { %v145_v20 = vadd.f32 %v420_v19, %v44_v18  ;;  %v139_v21 = vpop.f32.mrb[1].mxu0 }
  0xd9   :  { %v140_v22 = vadd.f32 %v139_v21, %v39_v16 }
  0xda   :  { %470 = vtanh.f32 %v145_v20 }
  0xdb   :  { %472 = vtanh.f32 %v140_v22  ;;  %v423_v24 = vpop.f32.mrb[2].mxu0 }
  0xdc   :  { %v155_v25 = vadd.f32 %v423_v24, %v54_v23  ;;  %v149_v26 = vpop.f32.mrb[3].mxu0 }
  0xdd   :  { %v150_v27 = vadd.f32 %v149_v26, %v49_v17 }
  0xde   :  { %474 = vtanh.f32 %v155_v25 }
  0xdf   :  { %476 = vtanh.f32 %v150_v27 }
  0xe4   :  { %v471_v28 = vpop.eup %470 }
  0xe5   :  { %v473_v29 = vpop.eup %472 }
  0xe6   :  { %v449_v30 = vpack.c.bf16 %v471_v28, %v473_v29 }
  0xe8   :  { %v475_v31 = vpop.eup %474  ;;  %450 = vmatprep.subr.bf16.mxu1 %v449_v30 }
  0xe9   :  { %v477_v32 = vpop.eup %476  ;;  %452 = vmatpush3.bf16.msra.mxu1 %v449_v30 }
  0xea   :  { %v453_v33 = vpack.c.bf16 %v475_v31, %v477_v32 }
  0xec   :  { %454 = vmatprep.subr.bf16.mxu1 %v453_v33 }
  0xed   :  { %456 = vmatpush3.bf16.msra.mxu1 %v453_v33 }
  0xf0   :  { %433 = vmatmul.mubr.msk.f32.vlgmr.msra.gmra.mrb[0].mxu1 %vm190_vm2, %v163_v34 }
  0xf1   :  { %435 = vmatprep.mubr.msk.f32.mxu1 %vm190_vm2, %v164_v35 }
  0xf4   :  { %436 = vmatmul.mubr.msk.f32.gmra.mrb[2].mxu1 %vm190_vm2, %v165_v36 }
 0x1c3   :  { %v434_v41 = vpop.f32.mrb[0].mxu1 }
 0x1c4   :  { %v275_v42 = vadd.f32 %v434_v41, %v178_v39  ;;  %v269_v43 = vpop.f32.mrb[1].mxu1 }
 0x1c5   :  { %v270_v44 = vadd.f32 %v269_v43, %v173_v40 }
 0x1c6   :  { %478 = vtanh.f32 %v275_v42 }
 0x1c7   :  { %480 = vtanh.f32 %v270_v44  ;;  %v437_v46 = vpop.f32.mrb[2].mxu1 }
 0x1c8   :  { %v285_v48 = vadd.f32 %v437_v46, %v188_v45  ;;  %v279_v49 = vpop.f32.mrb[3].mxu1 }
 0x1c9   :  { %v280_v50 = vadd.f32 %v279_v49, %v183_v47 }
 0x1ca   :  { %482 = vtanh.f32 %v285_v48 }
 0x1cb   :  { %484 = vtanh.f32 %v280_v50 }
 0x1d0   :  { %v479_v51 = vpop.eup %478 }
 0x1d1   :  { %v481_v52 = vpop.eup %480 }
 0x1d2   :  { %v458_v53 = vpack.c.bf16 %v479_v51, %v481_v52 }
 0x1d4   :  { %v483_v54 = vpop.eup %482  ;;  %459 = vmatpush3.bf16.msra.mxu0 %v458_v53 }
 0x1d5   :  { %v485_v55 = vpop.eup %484  ;;  %460 = vmatprep.subr.bf16.mxu0 %v511_v37 }
 0x1d6   :  { %v461_v56 = vpack.c.bf16 %v483_v54, %v485_v55 }
 0x1d8   :  { %462 = vmatpush3.bf16.msra.mxu0 %v461_v56 }
 0x1db   :  { %447 = vmatmul.mubr.msk.f32.vlgmr.msra.gmra.mrb[4].mxu0 %vm190_vm2, %v292_v57 }
 0x2ae   :  { %v368_v59 = vpop.f32.mrb[4].mxu0 }
 0x2af   :  { %v369_v60 = vadd.f32 %v368_v59, %v297_v58  ;;  %v448_v61 = vpop.f32.mrb[5].mxu0 }
 0x2b1   :  { %373 = vst.msk [vmem:[#allocation2] sm:$0xff] %vm372_vm4, %v369_v60 }
 0x2b2   :  { %497 = shalt.err (!%p494_p4)
}
 0x2b3   :  { %s498_s13 = scalar_lea.hbm %s640_s7, 128 }
 0x2b4   :  { %p499_p5 = scmp.ne.s32.totalorder %s640_s7, %s498_s13  ;;  %p502_p6 = scmp.lt.u32.totalorder %s498_s13, %s640_s7 }
 0x2b6   :  { %p504_p7 = pnand %p502_p6, %p499_p5 }
 0x2b8   :  { %507 = shalt.err (!%p504_p7)
}
 0x2b9   :  { %383 = dma.vmem_to_hbm [thread:$0]  %s381_s0, 128, %s640_s7, [#allocation3]  }
 0x2ba   :  { %508 = dma.done.wait [#allocation3], 128  }
 0x2bb   :  { %509 = vsyncadd [#allocation3], 4294967168 }
 0x2bc   :  { %387 = vsyncpa [#allocation3], 1 }

</bundles_post_ra>
